<compile_context>
chip_gen: v6e
topology: v6e:2x2x1
jax: 0.10.0
libtpu: 0.0.40
codegen_flags: <defaults>
</compile_context>

<pallas_src>
import functools

import jax
import jax.numpy as jnp
import numpy as np
from jax.experimental import pallas as pl
from jax.experimental.pallas import tpu as pltpu

LANE = 128           # final projection padded to a full lane width internally
NEG_PAD = -1e9       # padded logit lanes (f32); exp(NEG_PAD - m) underflows to 0


# ---------------------------------------------------------------------------
# Hop 1: h1 = relu( rs * (A_sl @ (cs * (x @ W_gcn))) + b_gcn )
#   - BN1 (eval) folded into W_gcn / b_gcn.
#   - A_sl is the raw 0/1 (+ self-loop) structure; rs/cs are f32 deg^-1/2.
#   - grid = (row tiles [parallel], A-column tiles [arbitrary reduction]).
# ---------------------------------------------------------------------------
def _hop1_kernel(a_ref, x_ref, cs_ref, rs_ref, wg_ref, bg_ref, h1_ref, acc_ref):
    k = pl.program_id(1)

    @pl.when(k == 0)
    def _():
        acc_ref[...] = jnp.zeros_like(acc_ref)

    # xw for this k-tile of nodes (recomputed per row tile: ~d/tk extra flops,
    # avoids an extra kernel + HBM round trip for xw; A stream dominates).
    xw = jnp.dot(x_ref[...], wg_ref[...], preferred_element_type=jnp.float32)
    xw = (xw * cs_ref[...]).astype(jnp.bfloat16)        # f32 GCN column scale
    acc_ref[...] += jnp.dot(a_ref[...], xw, preferred_element_type=jnp.float32)

    @pl.when(k == pl.num_programs(1) - 1)
    def _():
        h1 = acc_ref[...] * rs_ref[...] + bg_ref[...]   # f32 row scale + bias
        h1_ref[...] = jnp.maximum(h1, 0.0).astype(h1_ref.dtype)


# ---------------------------------------------------------------------------
# Hop 2: SAGEConv (mean aggr, BN2 folded, W_l/W_r fused) + ReLU + MLP
#        + log_softmax, with a compact (tm, output_dim) f32 store.
# ---------------------------------------------------------------------------
def _hop2_kernel(a_ref, h1k_ref, rs_ref, h1i_ref, ws_ref, bs_ref,
                 w1_ref, b1_ref, w2_ref, b2_ref, out_ref, acc_ref, *, out_dim):
    k = pl.program_id(1)

    @pl.when(k == 0)
    def _():
        acc_ref[...] = jnp.zeros_like(acc_ref)

    # Mean-aggregation reduction: acc += A[i-tile, k-tile] @ h1[k-tile].
    acc_ref[...] += jnp.dot(a_ref[...], h1k_ref[...],
                            preferred_element_type=jnp.float32)

    @pl.when(k == pl.num_programs(1) - 1)
    def _():
        f32, bf16 = jnp.float32, jnp.bfloat16
        agg = (acc_ref[...] * rs_ref[...]).astype(bf16)   # f32 1/deg row scale
        h1 = h1i_ref[...]                                  # own rows (tm, d)

        # SAGEConv: fused W_l / W_r matmul over concat([agg, h1]) (K = 2d).
        # NOTE: lane concat uses the (idle) XLU; fall back to two dots + VPU
        # add if a scaled profile ever shows XLU pressure.
        hc = jnp.concatenate([agg, h1], axis=-1)
        h2 = jnp.dot(hc, ws_ref[...], preferred_element_type=f32) + bs_ref[...]
        h2 = jnp.maximum(h2, 0.0).astype(bf16)

        # MLP: Linear(d, d//2) -> ReLU -> Linear(d//2, LANE-padded).
        z1 = jnp.dot(h2, w1_ref[...], preferred_element_type=f32) + b1_ref[...]
        z1 = jnp.maximum(z1, 0.0).astype(bf16)
        z = jnp.dot(z1, w2_ref[...], preferred_element_type=f32) + b2_ref[...]

        # log_softmax over f32 lane-padded logits (padded lanes contribute 0);
        # store only the real out_dim columns (compact writeback).
        m = jnp.max(z, axis=-1, keepdims=True)
        s = z - m
        lse = jnp.log(jnp.sum(jnp.exp(s), axis=-1, keepdims=True))
        out_ref[...] = (s - lse)[:, :out_dim]


# ---------------------------------------------------------------------------
# Wrapper
# ---------------------------------------------------------------------------
def gcn_forward_pallas(adj, x, packed, output_dim, *, tm=None, tk=None):
    gcn_struct, gcn_scale, sage_struct, sage_scale = adj
    w_gcn, w_sage, w1, w2p, b_gcn, b_sage, b1, b2p = packed
    N, d = x.shape

    # Row tile: >=2 programs on the "parallel" axis (v7x has 2 TCs).
    # Column (reduction) tile must be a multiple of 128 lanes or the full N;
    # at toy N it is the full N (grid k-axis degenerates to 1 but the
    # accumulator/reduction structure is the one that scales).
    # TODO(synk): at real N pick tm ~256-512, tk >= 512 and re-derive the
    # double-buffered A-tile budget against v7x's 64 MiB VMEM (half of v5e/v6e).
    if tm is None:
        tm = N // 2 if (N % 16 == 0 and N >= 32) else N
    if tk is None:
        tk = min(N, 512) if N % 128 == 0 else N
    assert N % tm == 0 and N % tk == 0
    n_i, n_k = N // tm, N // tk

    x_bf = x.astype(jnp.bfloat16)

    cparams = pltpu.CompilerParams(
        dimension_semantics=("parallel", "arbitrary"),
        vmem_limit_bytes=32 * 1024 * 1024)

    def const_spec(arr):
        shp = arr.shape
        return pl.BlockSpec(shp, lambda i, k, _n=len(shp): (0,) * _n)

    # ---- hop 1: GCNConv + BN1 + ReLU -> h1 (N, d) bf16 in HBM ---------------
    h1 = pl.pallas_call(
        _hop1_kernel,
        out_shape=jax.ShapeDtypeStruct((N, d), jnp.bfloat16),
        grid=(n_i, n_k),
        in_specs=[
            pl.BlockSpec((tm, tk), lambda i, k: (i, k)),   # A_sl 0/1 structure
            pl.BlockSpec((tk, d), lambda i, k: (k, 0)),    # x rows (k-tile)
            pl.BlockSpec((tk, 1), lambda i, k: (k, 0)),    # deg^-1/2 (column)
            pl.BlockSpec((tm, 1), lambda i, k: (i, 0)),    # deg^-1/2 (row)
            const_spec(w_gcn),
            const_spec(b_gcn),
        ],
        out_specs=pl.BlockSpec((tm, d), lambda i, k: (i, 0)),
        scratch_shapes=[pltpu.VMEM((tm, d), jnp.float32)],
        compiler_params=cparams,
    )(gcn_struct, x_bf, gcn_scale, gcn_scale, w_gcn, b_gcn)

    # ---- hop 2: SAGEConv + BN2 + ReLU + MLP + log_softmax -------------------
    out = pl.pallas_call(
        functools.partial(_hop2_kernel, out_dim=output_dim),
        out_shape=jax.ShapeDtypeStruct((N, output_dim), jnp.float32),
        grid=(n_i, n_k),
        in_specs=[
            pl.BlockSpec((tm, tk), lambda i, k: (i, k)),   # A 0/1 structure
            pl.BlockSpec((tk, d), lambda i, k: (k, 0)),    # h1 (k-tile)
            pl.BlockSpec((tm, 1), lambda i, k: (i, 0)),    # 1/deg (row)
            pl.BlockSpec((tm, d), lambda i, k: (i, 0)),    # h1 (own rows)
            const_spec(w_sage), const_spec(b_sage),
            const_spec(w1), const_spec(b1),
            const_spec(w2p), const_spec(b2p),
        ],
        out_specs=pl.BlockSpec((tm, output_dim), lambda i, k: (i, 0)),
        scratch_shapes=[pltpu.VMEM((tm, d), jnp.float32)],
        compiler_params=cparams,
    )(sage_struct, h1, sage_scale, h1, w_sage, b_sage, w1, b1, w2p, b2p)
    return out


# ---------------------------------------------------------------------------
# Glue: adjacency structure + f32 normalisation scales, deterministic params.
# ---------------------------------------------------------------------------
def build_adjacency(edge_index, num_nodes):
    src, dst = edge_index[0], edge_index[1]
    # A[i, j] = multiplicity of edge j -> i (messages flow source -> target).
    A = jnp.zeros((num_nodes, num_nodes), jnp.float32).at[dst, src].add(1.0)

    # GCNConv: D^-1/2 (A + I) D^-1/2.  Keep the small-integer structure exact
    # (bf16) and the normalisation as separate f32 per-node scales.
    A_sl = A + jnp.eye(num_nodes, dtype=jnp.float32)
    d_inv_sqrt = 1.0 / jnp.sqrt(jnp.sum(A_sl, axis=1))
    gcn_struct = A_sl.astype(jnp.bfloat16)
    gcn_scale = d_inv_sqrt[:, None].astype(jnp.float32)          # (N, 1)

    # SAGEConv mean aggregation: row scale 1/deg (empty neighbourhood -> 0).
    deg_in = jnp.sum(A, axis=1)
    sage_struct = A.astype(jnp.bfloat16)
    sage_scale = (1.0 / jnp.maximum(deg_in, 1.0))[:, None].astype(jnp.float32)
    return gcn_struct, gcn_scale, sage_struct, sage_scale


def init_raw_params(key, input_dim, output_dim):
    hidden = input_dim // 2
    ks = jax.random.split(key, 8)
    scale = 0.1
    w_gcn = scale * jax.random.normal(ks[0], (input_dim, input_dim), jnp.float32)
    b_gcn = scale * jax.random.normal(ks[1], (1, input_dim), jnp.float32)
    w_sage_l = scale * jax.random.normal(ks[2], (input_dim, input_dim), jnp.float32)
    b_sage = scale * jax.random.normal(ks[3], (1, input_dim), jnp.float32)
    w_sage_r = scale * jax.random.normal(ks[4], (input_dim, input_dim), jnp.float32)
    w1 = scale * jax.random.normal(ks[5], (input_dim, hidden), jnp.float32)
    b1 = scale * jax.random.normal(ks[6], (1, hidden), jnp.float32)
    w2 = scale * jax.random.normal(ks[7], (hidden, output_dim), jnp.float32)
    b2 = jnp.zeros((1, output_dim), jnp.float32)

    # BatchNorm1d eval-mode fold inputs: gamma=1, beta=0, mean=0, var=1 (defaults)
    eps = 1e-5
    s1 = jnp.full((1, input_dim), 1.0 / np.sqrt(1.0 + eps), jnp.float32)
    t1 = jnp.zeros((1, input_dim), jnp.float32)
    s2 = jnp.full((1, input_dim), 1.0 / np.sqrt(1.0 + eps), jnp.float32)
    t2 = jnp.zeros((1, input_dim), jnp.float32)

    return (w_gcn, b_gcn, s1, t1, w_sage_l, b_sage, w_sage_r, s2, t2,
            w1, b1, w2, b2)


def pack_params(raw, input_dim, output_dim):
    """Fold BN into weights, fuse the SAGE matmuls, pad the final projection."""
    (w_gcn, b_gcn, s1, t1, w_sage_l, b_sage, w_sage_r, s2, t2,
     w1, b1, w2, b2) = raw
    hidden = w1.shape[1]

    # Fold BN1 into the GCN conv (per output column); relu commutes with s > 0.
    w_gcn_f = (w_gcn * s1).astype(jnp.bfloat16)
    b_gcn_f = (b_gcn * s1 + t1).astype(jnp.float32)

    # Fold BN2 into the SAGE conv and fuse W_l / W_r into one (2d, d) weight.
    w_sage_f = jnp.concatenate([w_sage_l * s2, w_sage_r * s2],
                               axis=0).astype(jnp.bfloat16)
    b_sage_f = (b_sage * s2 + t2).astype(jnp.float32)

    # Pad the final projection to a full lane width; padded logit lanes get a
    # large negative bias so exp() underflows to exactly 0 in the f32 softmax.
    w2p = jnp.zeros((hidden, LANE), jnp.float32).at[:, :output_dim].set(w2)
    w2p = w2p.astype(jnp.bfloat16)
    b2p = jnp.full((1, LANE), NEG_PAD, jnp.float32).at[0, :output_dim].set(b2[0])

    return (w_gcn_f, w_sage_f, w1.astype(jnp.bfloat16), w2p,
            b_gcn_f, b_sage_f, b1.astype(jnp.float32), b2p)


def reference_forward(a_gcn, a_mean, x, raw):
    """Pure-JAX f32 reference matching the PyTorch forward (eval mode)."""
    (w_gcn, b_gcn, s1, t1, w_sage_l, b_sage, w_sage_r, s2, t2,
     w1, b1, w2, b2) = raw
    h = a_gcn @ (x @ w_gcn) + b_gcn
    h = jnp.maximum(h * s1 + t1, 0.0)
    h2 = (a_mean @ h) @ w_sage_l + h @ w_sage_r + b_sage
    h2 = jnp.maximum(h2 * s2 + t2, 0.0)
    z1 = jnp.maximum(h2 @ w1 + b1, 0.0)
    z = z1 @ w2 + b2
    return jax.nn.log_softmax(z, axis=1)


if __name__ == "__main__":
    # Small synthetic graph: 32 nodes, 2 graphs, symmetric ring edges per graph.
    N = 32
    input_dim = 32
    output_dim = 8

    nodes_per_graph = N // 2
    src_list, dst_list = [], []
    for g in range(2):
        base = g * nodes_per_graph
        for i in range(nodes_per_graph):
            j = (i + 1) % nodes_per_graph
            src_list += [base + i, base + j]
            dst_list += [base + j, base + i]
    edge_index = jnp.asarray(np.stack([src_list, dst_list]), jnp.int32)

    key = jax.random.PRNGKey(0)
    kx, kp = jax.random.split(key)
    x = jax.random.normal(kx, (N, input_dim), jnp.float32)
    raw = init_raw_params(kp, input_dim, output_dim)
    packed = pack_params(raw, input_dim, output_dim)
    adj = build_adjacency(edge_index, N)

    out = gcn_forward_pallas(adj, x, packed, output_dim)
    out = jax.block_until_ready(out)

    # f32 dense reference matrices rebuilt from the exact structure + scales.
    gcn_struct, gcn_scale, sage_struct, sage_scale = adj
    a_gcn_ref = gcn_scale * gcn_struct.astype(jnp.float32) * gcn_scale[:, 0][None, :]
    a_mean_ref = sage_scale * sage_struct.astype(jnp.float32)
    ref = reference_forward(a_gcn_ref, a_mean_ref, x, raw)

    np.testing.assert_allclose(np.asarray(out), np.asarray(ref),
                               rtol=5e-2, atol=5e-2)
    print("KERNEL_OK")
</pallas_src>

<mosaic_0001>
module attributes {stable_mosaic.version = 11 : i64} {
  func.func @_hop1_kernel(%arg0: i32, %arg1: i32, %arg2: memref<16x32xbf16, #tpu.memory_space<vmem>>, %arg3: memref<32x32xbf16, #tpu.memory_space<vmem>>, %arg4: memref<32x1xf32, #tpu.memory_space<vmem>>, %arg5: memref<16x1xf32, #tpu.memory_space<vmem>>, %arg6: memref<32x32xbf16, #tpu.memory_space<vmem>>, %arg7: memref<1x32xf32, #tpu.memory_space<vmem>>, %arg8: memref<16x32xbf16, #tpu.memory_space<vmem>>, %arg9: memref<16x32xf32, #tpu.memory_space<vmem>>) attributes {dimension_semantics = [#tpu.dimension_semantics<parallel>, #tpu.dimension_semantics<arbitrary>], iteration_bounds = array<i64: 2, 1>, scalar_prefetch = 0 : i64, scratch_operands = 1 : i64, tpu.core_type = #tpu.core_type<tc>, window_params = [{transform_indices = @transform_0, window_bounds = array<i64: 16, 32>}, {transform_indices = @transform_1, window_bounds = array<i64: 32, 32>}, {transform_indices = @transform_2, window_bounds = array<i64: 32, 1>}, {transform_indices = @transform_3, window_bounds = array<i64: 16, 1>}, {pipeline_mode = #tpu.pipeline_mode<synchronous>, transform_indices = @transform_4, window_bounds = array<i64: 32, 32>}, {pipeline_mode = #tpu.pipeline_mode<synchronous>, transform_indices = @transform_5, window_bounds = array<i64: 1, 32>}, {transform_indices = @transform_6, window_bounds = array<i64: 16, 32>}]} {
    %c0_i32 = arith.constant 0 : i32
    %0 = arith.cmpi eq, %arg1, %c0_i32 : i32
    %1 = arith.extui %0 : i1 to i32
    %c0_i32_0 = arith.constant 0 : i32
    %2 = arith.cmpi ne, %1, %c0_i32_0 : i32
    scf.if %2 {
      %cst_15 = arith.constant 0.000000e+00 : f32
      %18 = vector.broadcast %cst_15 : f32 to vector<16x32xf32>
      %c0_16 = arith.constant 0 : index
      %c0_17 = arith.constant 0 : index
      %19 = vector.load %arg9[%c0_16, %c0_17] : memref<16x32xf32, #tpu.memory_space<vmem>>, vector<16x32xf32>
      tpu.vector_store %arg9[%c0_16, %c0_17], %18 {strides = array<i32>} : memref<16x32xf32, #tpu.memory_space<vmem>>, vector<16x32xf32>,
    } else {
    }
    %c0 = arith.constant 0 : index
    %c0_1 = arith.constant 0 : index
    %3 = vector.load %arg3[%c0, %c0_1] : memref<32x32xbf16, #tpu.memory_space<vmem>>, vector<32x32xbf16>
    %c0_2 = arith.constant 0 : index
    %c0_3 = arith.constant 0 : index
    %4 = vector.load %arg6[%c0_2, %c0_3] : memref<32x32xbf16, #tpu.memory_space<vmem>>, vector<32x32xbf16>
    %cst = arith.constant dense<0.000000e+00> : vector<32x32xf32>
    %5 = tpu.matmul %3, %4, %cst {dimension_numbers = #tpu.dot_dimension_numbers<[1], [0], [0], [1], [0, 0, 1, 1], [], []>} : vector<32x32xbf16>, vector<32x32xbf16>, vector<32x32xf32> -> vector<32x32xf32>
    %c0_4 = arith.constant 0 : index
    %c0_5 = arith.constant 0 : index
    %6 = vector.load %arg4[%c0_4, %c0_5] : memref<32x1xf32, #tpu.memory_space<vmem>>, vector<32x1xf32>
    %7 = vector.broadcast %6 : vector<32x1xf32> to vector<32x32xf32>
    %8 = arith.mulf %5, %7 : vector<32x32xf32>
    %9 = arith.truncf %8 : vector<32x32xf32> to vector<32x32xbf16>
    %c0_6 = arith.constant 0 : index
    %c0_7 = arith.constant 0 : index
    %10 = vector.load %arg9[%c0_6, %c0_7] : memref<16x32xf32, #tpu.memory_space<vmem>>, vector<16x32xf32>
    %c0_8 = arith.constant 0 : index
    %c0_9 = arith.constant 0 : index
    %11 = vector.load %arg2[%c0_8, %c0_9] : memref<16x32xbf16, #tpu.memory_space<vmem>>, vector<16x32xbf16>
    %cst_10 = arith.constant dense<0.000000e+00> : vector<16x32xf32>
    %12 = tpu.matmul %11, %9, %cst_10 {dimension_numbers = #tpu.dot_dimension_numbers<[1], [0], [0], [1], [0, 0, 1, 1], [], []>} : vector<16x32xbf16>, vector<32x32xbf16>, vector<16x32xf32> -> vector<16x32xf32>
    %13 = arith.addf %10, %12 : vector<16x32xf32>
    %c0_11 = arith.constant 0 : index
    %c0_12 = arith.constant 0 : index
    %14 = vector.load %arg9[%c0_11, %c0_12] : memref<16x32xf32, #tpu.memory_space<vmem>>, vector<16x32xf32>
    tpu.vector_store %arg9[%c0_11, %c0_12], %13 {strides = array<i32>} : memref<16x32xf32, #tpu.memory_space<vmem>>, vector<16x32xf32>,
    %c0_i32_13 = arith.constant 0 : i32
    %15 = arith.cmpi eq, %arg1, %c0_i32_13 : i32
    %16 = arith.extui %15 : i1 to i32
    %c0_i32_14 = arith.constant 0 : i32
    %17 = arith.cmpi ne, %16, %c0_i32_14 : i32
    scf.if %17 {
      %c0_15 = arith.constant 0 : index
      %c0_16 = arith.constant 0 : index
      %18 = vector.load %arg9[%c0_15, %c0_16] : memref<16x32xf32, #tpu.memory_space<vmem>>, vector<16x32xf32>
      %c0_17 = arith.constant 0 : index
      %c0_18 = arith.constant 0 : index
      %19 = vector.load %arg5[%c0_17, %c0_18] : memref<16x1xf32, #tpu.memory_space<vmem>>, vector<16x1xf32>
      %20 = vector.broadcast %19 : vector<16x1xf32> to vector<16x32xf32>
      %21 = arith.mulf %18, %20 : vector<16x32xf32>
      %c0_19 = arith.constant 0 : index
      %c0_20 = arith.constant 0 : index
      %22 = vector.load %arg7[%c0_19, %c0_20] : memref<1x32xf32, #tpu.memory_space<vmem>>, vector<1x32xf32>
      %23 = vector.broadcast %22 : vector<1x32xf32> to vector<16x32xf32>
      %24 = arith.addf %21, %23 : vector<16x32xf32>
      %cst_21 = arith.constant 0.000000e+00 : f32
      %25 = vector.broadcast %cst_21 : f32 to vector<16x32xf32>
      %26 = arith.maximumf %24, %25 : vector<16x32xf32>
      %27 = arith.truncf %26 : vector<16x32xf32> to vector<16x32xbf16>
      %c0_22 = arith.constant 0 : index
      %c0_23 = arith.constant 0 : index
      %28 = vector.load %arg8[%c0_22, %c0_23] : memref<16x32xbf16, #tpu.memory_space<vmem>>, vector<16x32xbf16>
      tpu.vector_store %arg8[%c0_22, %c0_23], %27 {strides = array<i32>} : memref<16x32xbf16, #tpu.memory_space<vmem>>, vector<16x32xbf16>,
    } else {
    }
    return
  }
  func.func @transform_0(%arg0: i32, %arg1: i32) -> (i32, i32) {
    %c0_i32 = arith.constant 0 : i32
    return %arg0, %arg1 : i32, i32
  }
  func.func @transform_1(%arg0: i32, %arg1: i32) -> (i32, i32) {
    %c0_i32 = arith.constant 0 : i32
    %c0_i32_0 = arith.constant 0 : i32
    return %arg1, %c0_i32 : i32, i32
  }
  func.func @transform_2(%arg0: i32, %arg1: i32) -> (i32, i32) {
    %c0_i32 = arith.constant 0 : i32
    %c0_i32_0 = arith.constant 0 : i32
    return %arg1, %c0_i32 : i32, i32
  }
  func.func @transform_3(%arg0: i32, %arg1: i32) -> (i32, i32) {
    %c0_i32 = arith.constant 0 : i32
    %c0_i32_0 = arith.constant 0 : i32
    return %arg0, %c0_i32 : i32, i32
  }
  func.func @transform_4(%arg0: i32, %arg1: i32) -> (i32, i32) {
    %c0_i32 = arith.constant 0 : i32
    %c0_i32_0 = arith.constant 0 : i32
    %c0_i32_1 = arith.constant 0 : i32
    return %c0_i32, %c0_i32_0 : i32, i32
  }
  func.func @transform_5(%arg0: i32, %arg1: i32) -> (i32, i32) {
    %c0_i32 = arith.constant 0 : i32
    %c0_i32_0 = arith.constant 0 : i32
    %c0_i32_1 = arith.constant 0 : i32
    return %c0_i32, %c0_i32_0 : i32, i32
  }
  func.func @transform_6(%arg0: i32, %arg1: i32) -> (i32, i32) {
    %c0_i32 = arith.constant 0 : i32
    %c0_i32_0 = arith.constant 0 : i32
    return %arg0, %c0_i32 : i32, i32
  }
}

</mosaic_0001>

<bundles_post_ra>
// kernel: tpu_custom_call.1
= control target key start
LH: loop header
LB: loop body
LE: loop exit
PB: predicated region body
PF: predicated region fallthrough
CT: control target
= control target key end

     0   :  { %11 = vsyncpa [#allocation4], 0  ;;  %s1087_s0 = inlined_call_operand.vmem [shape: bf16[32,32], index: 0, kind: input, shape index: {}]   ;;  %s1088_s1 = inlined_call_operand.vmem [shape: bf16[32,32], index: 1, kind: input, shape index: {}]   ;;  %s1089_s2 = inlined_call_operand.vmem [shape: f32[32,1], index: 2, kind: input, shape index: {}]   ;;  %s1090_s3 = inlined_call_operand.vmem [shape: f32[32,1], index: 3, kind: input, shape index: {}]   ;;  %s1091_s4 = inlined_call_operand.vmem [shape: bf16[32,32], index: 4, kind: input, shape index: {}]   ;;  %s1092_s5 = inlined_call_operand.vmem [shape: f32[1,32], index: 5, kind: input, shape index: {}]   ;;  %s1093_s6 = inlined_call_operand.hbm [shape: bf16[32,32], index: 6, kind: output, shape index: {}]  }
   0x1   :  { %13 = vsyncpa [#allocation4 + $0x1], 0  ;;  %s933_s21 = smov 0   ;;  %s935_s22 = smov 0  }
   0x2   :  { %s937_s23 = smov 0   ;;  %s939_s24 = smov 0  }
   0x3   :  { %s941_s25 = smov 0   ;;  %s943_s26 = smov 0  }
   0x4 LB: > { %s693_s27 = sadd.s32 4294967295, %s890_s26   ;;  %s694_s28 = sadd.s32 4294967294, %s890_s26   ;;  %s890_s26 = sphi %s943_s26, %s19_s26   ;;  %s886_s25 = sphi %s941_s25, %s1100_s25   ;;  %s882_s24 = sphi %s939_s24, %s1099_s24   ;;  %s878_s23 = sphi %s937_s23, %s1098_s23   ;;  %s874_s22 = sphi %s935_s22, %s1097_s22   ;;  %s870_s21 = sphi %s933_s21, %s1096_s21  }
   0x5   : > { %s31_s29 = sadd.s32 1, %s886_s25  ;;  %s186_s30 = sadd.s32 1, %s878_s23 }
   0x6   : > { %p33_p0 = scmp.ge.s32.totalorder %s31_s29, 2  ;;  %p196_p1 = scmp.ne.s32.totalorder %s878_s23, %s874_s22 }
   0x7   : > { %p197_p2 = scmp.eq.s32.totalorder %s693_s27, 1  ;;  %p202_p3 = scmp.ne.s32.totalorder %s874_s22, %s870_s21 }
   0x8   : > { %s1102_s29 = smov (%p33_p0, %s31_s29), 0  ;;  %p203_p5 = scmp.eq.s32.totalorder %s694_s28, 1 }
   0x9   : > { %p973_p4 = por %p197_p2, %p196_p1  ;;  %s183_s8 = ssub.s32 %s886_s25, %s1102_s29 }
   0xa   : > { %p699_p6 = scmp.ge.s32.totalorder %s890_s26, 1  ;;  %p184_p7 = scmp.eq.s32.totalorder %s183_s8, 0 }
   0xb   : > { %p980_p8 = por %p203_p5, %p202_p3  ;;  %p266_p9 = scmp.lt.s32.totalorder %s890_s26, 3 }
   0xc   : > { %s986_s10 = scalar_select %p184_p7, %s878_s23, %s186_s30  }
   0xd   : > { %p267_p10 = pnand %p699_p6, %p266_p9 }
   0xe   : > { %s701_s17 = sshll.u32 (!%p267_p10), %s882_s24, 1  ;;  %s723_s12 = sshll.u32 (!%p267_p10), %s882_s24, 7 }
   0xf   : > { %270 = sbr.rel (%p267_p10) target bundleno = 466 (0x1d2), region = 44  ;;  %p315_p11 = scmp.lt.s32.totalorder (!%p267_p10), %s701_s17, 3 }
  0x10   : > { %s895_s24 = smov (!%p267_p10), [#allocation3]  }
  0x11   : > { %s818_s27 = sshll.u32 (!%p267_p10), %s895_s24, 4  ;;  %s819_s27 = int_to_ptr.vmem [resolvable:$false] %s818_s27 }
  0x14   : > { %v809_v0 = vld [vmem:[%s1091_s4 + $0x8] sm:$0xff]   ;;  %vm347_vm0 = vcmask 261120   ;;  %v810_v1 = vld [vmem:[%s1091_s4] sm:$0xff]   ;;  %v892_v3 = vmov 0   ;;  %v438_v4 = vld [vmem:[%s1089_s2 + $0x10] sm:$0xff]  ;;  %s1104_s17 = smov (!%p315_p11, %s701_s17), 3 }
  0x15   : > { %731 = vmatprep.subr.bf16.mxu0 %v809_v0  ;;  %v811_v2 = vld [vmem:[%s1088_s1] sm:$0xff]   ;;  %807 = vset.pattern.permute.xlu0 %v892_v3  ;;  %v812_v6 = vld [vmem:[%s1088_s1 + $0x8] sm:$0xff]   ;;  %v439_v7 = vld [vmem:[%s1089_s2 + $0x18] sm:$0xff]  ;;  %s704_s14 = sshll.u32 %s1104_s17, 3  ;;  %v893_v11 = vmov 0.0   ;;  %vm894_vm1 = vmmov 0  }
  0x16   : > { %732 = vmatpush3.bf16.msra.mxu0 %v809_v0  ;;  %808 = vset.pattern.permute.xlu1 %v892_v3  ;;  %v436_v5 = vld [vmem:[%s1089_s2] sm:$0xff]  ;;  %v437_v8 = vld [vmem:[%s1089_s2 + $0x8] sm:$0xff]  ;;  %s339_s18 = scalar_lea.vmem %s1090_s3, %s704_s14  ;;  %348 = vst.msk [vmem:[#allocation2] sm:$0xff] %vm347_vm0, %v893_v11  ;;  %349 = vst.msk [vmem:[#allocation2 + $0x8] sm:$0xff] %vm347_vm0, %v893_v11  ;;  %s702_s19 = sshll.u32 %s1104_s17, 2  ;;  %vm561_vm2 = vcmask 257024  }
  0x17   : > { %733 = vmatprep.subr.bf16.mxu0 %v810_v1  ;;  %735 = vmatprep.mubr.msk.bf16.mxu0 %vm347_vm0, %v811_v2  ;;  %v528_v9 = vld [vmem:[%s339_s18] sm:$0xff]  ;;  %v529_v10 = vld [vmem:[%s339_s18 + $0x8] sm:$0xff]  ;;  %s321_s28 = scalar_lea.vmem %s1087_s0, %s702_s19  ;;  %s311_s17 = sand.u32 1, %s874_s22  }
  0x18   : > { %452 = vperm.xlu0 %807, %v438_v4   ;;  %442 = vperm.xlu1 %808, %v436_v5   ;;  %v468_v24 = vld [vmem:[%s321_s28] sm:$0xff]   ;;  %s700_s11 = sshll.u32 %s311_s17, 3  ;;  %s1038_s18 = scalar_lea.hbm %s1093_s6, %s723_s12 }
  0x19   : > { %739 = vmatprep.subr.bf16.mxu1 %v893_v11  ;;  %743 = vmatprep.mubr.msk.bf16.mxu1 %vm894_vm1, %v893_v11  ;;  %v713_v37 = vld [vmem:[%s1092_s5] ss:$0 sm:$0xff]  ;;  %s313_s13 = scalar_lea.vmem [#allocation3], %s700_s11  ;;  %s1042_s19 = scalar_lea.sflag [#allocation4], %s311_s17 }
  0x1a   : > { %734 = vmatpush3.bf16.msra.mxu0 %v810_v1  ;;  %s578_s14 = sshll.u32 %s313_s13, 4  ;;  %s820_s28 = scalar_lea.vmem %s819_s27, 256  ;;  %s1040_s14 = int_to_ptr.vmem [resolvable:$true] %s578_s14 }
  0x1b   : > { %s814_s20 = scalar_lea.vmem %s1040_s14, 128  ;;  %p821_p1 = scmp.lt.s32.totalorder %s1040_s14, %s819_s27 }
  0x1c   : > { %457 = vperm.xlu0 %807, %v439_v7   ;;  %447 = vperm.xlu1 %808, %v437_v8   ;;  %p815_p12 = scmp.ne.s32.totalorder %s1040_s14, %s814_s20  ;;  %p822_p2 = scmp.lt.s32.totalorder %s820_s28, %s814_s20 }
  0x1d   : > { %736 = vmatmul.mubr.msk.bf16.vlgmr.msra.gmra.mxu0 %vm347_vm0, %v812_v6  ;;  %v466_v27 = vld [vmem:[#allocation2] sm:$0xff]  ;;  %v467_v31 = vld [vmem:[#allocation2 + $0x8] sm:$0xff] }
  0x1e   : > { %p816_p13 = pnand %p815_p12, %p973_p4  ;;  %p823_p3 = por %p822_p2, %p821_p1 }
  0x20   : > { %532 = vperm.xlu0 %807, %v528_v9   ;;  %537 = vperm.xlu1 %808, %v529_v10   ;;  %p817_p0 = pneg %p816_p13 }
  0x22   : > { %p824_p5 = pnand %p823_p3, %p817_p0 }
  0x93   : > { %v453_v12 = vpop.permute.xlu0 %452  ;;  %v443_v13 = vpop.permute.xlu1 %442 }
  0x97   : > { %v458_v16 = vpop.permute.xlu0 %457  ;;  %v448_v20 = vpop.permute.xlu1 %447 }
  0x9b   : > { %v533_v35 = vpop.permute.xlu0 %532  ;;  %v538_v40 = vpop.permute.xlu1 %537 }
  0xdd   : > { %v737_v14 = vpop.f32.mrf.mxu0 }
  0xde   : > { %v462_v18 = vmul.f32 %v737_v14, %v453_v12 }
  0xdf   : > { %v421_v15 = vpop.f32.mrf.mxu0 }
  0xe0   : > { %v460_v25 = vmul.f32 %v443_v13, %v421_v15 }
  0xe1   : > { %v738_v17 = vpop.f32.mrf.mxu0 }
  0xe2   : > { %v463_v19 = vmul.f32 %v738_v17, %v458_v16 }
  0xe3   : > { %v424_v21 = vpop.f32.mrf.mxu0 }
  0xe4   : > { %v461_v22 = vmul.f32 %v448_v20, %v424_v21  ;;  %v465_v23 = vpack.c.bf16 %v463_v19, %v462_v18 }
  0xe6   : > { %740 = vmatpush3.bf16.msra.mxu1 %v465_v23  ;;  %v464_v26 = vpack.c.bf16 %v461_v22, %v460_v25 }
  0xe7   : > { %741 = vmatprep.subr.bf16.mxu1 %v893_v11 }
  0xea   : > { %742 = vmatpush3.bf16.msra.mxu1 %v464_v26 }
  0xed   : > { %744 = vmatmul.mubr.msk.bf16.vlgmr.msra.gmra.mxu1 %vm347_vm0, %v468_v24 }
 0x1ad   : > { %v512_v28 = vpop.f32.mrf.mxu1 }
 0x1ae   : > { %v519_v29 = vadd.f32 %v512_v28, %v466_v27 }
 0x1af   : > { %v745_v30 = vpop.f32.mrf.mxu1 }
 0x1b0   : > { %521 = vst.msk [vmem:[#allocation2] sm:$0xff] %vm347_vm0, %v519_v29 }
 0x1b1   : > { %v515_v32 = vpop.f32.mrf.mxu1 }
 0x1b2   : > { %v520_v33 = vadd.f32 %v515_v32, %v467_v31 }
 0x1b3   : > { %v746_v34 = vpop.f32.mrf.mxu1 }
 0x1b4   : > { %522 = vst.msk [vmem:[#allocation2 + $0x8] sm:$0xff] %vm347_vm0, %v520_v33 }
 0x1b7   : > { %v526_v36 = vld [vmem:[#allocation2] sm:$0xff] }
 0x1b8   : > { %v540_v38 = vmul.f32 %v533_v35, %v526_v36 }
 0x1ba   : > { %v549_v39 = vadd.f32 %v713_v37, %v540_v38 }
 0x1bb   : > { %v527_v41 = vld [vmem:[#allocation2 + $0x8] sm:$0xff] }
 0x1bc   : > { %v541_v42 = vmul.f32 %v538_v40, %v527_v41  ;;  %v551_v43 = vmax.f32 %v549_v39, 0.0 }
 0x1be   : > { %v550_v44 = vadd.f32 %v713_v37, %v541_v42  ;;  %v721_v45 = vpack.c.bf16 %v551_v43, %v551_v43 }
 0x1c0   : > { %v552_v46 = vmax.f32 %v550_v44, 0.0  ;;  %562 = vst.msk [vmem:[%s313_s13] sm:$0xf] %vm561_vm2, %v721_v45 }
 0x1c2   : > { %v722_v47 = vpack.c.bf16 %v552_v46, %v552_v46 }
 0x1c4   : > { %563 = vst.msk [vmem:[%s313_s13 + $0x4] sm:$0xf] %vm561_vm2, %v722_v47 }
 0x1c5   : > { %827 = shalt.err (!%p824_p5)
}
 0x1c6   : > { %s828_s17 = scalar_lea.hbm %s1038_s18, 128  ;;  %s832_s11 = scalar_lea.hbm %s1093_s6, 256 }
 0x1c7   : > { %p829_p6 = scmp.ne.s32.totalorder %s1038_s18, %s828_s17  ;;  %p833_p10 = scmp.lt.s32.totalorder %s1038_s18, %s1093_s6 }
 0x1c8   : > { %p834_p11 = scmp.lt.s32.totalorder %s832_s11, %s828_s17 }
 0x1c9   : > { %p830_p7 = pnand %p829_p6, %p973_p4 }
 0x1ca   : > { %p835_p12 = por %p834_p11, %p833_p10 }
 0x1cb   : > { %p831_p9 = pneg %p830_p7 }
 0x1cd   : > { %p836_p13 = pnand %p835_p12, %p831_p9 }
 0x1cf   : > { %839 = shalt.err (!%p836_p13)
}
 0x1d0   : > { %s896_s15 = smov 64   ;;  %s897_s16 = smov 4  }
 0x1d1   : > { %747 = dma.vmem_to_hbm [thread:$0]  (%p973_p4), %s1040_s14, 128, %s1038_s18, %s1042_s19, %s896_s15, %s896_s15, %s897_s16  }
 0x1d2 PF: > { %p753_p0 = scmp.ge.s32.totalorder %s890_s26, 2  ;;  %s593_s20 = sand.u32 1, %s870_s21  }
 0x1d3   : > { %s594_s24 = scalar_lea.sflag [#allocation4], %s593_s20 }
 0x1d4   : > { %p750_p1 = pnand %p753_p0, %p980_p8 }
 0x1d6   : > { %p751_p2 = pneg %p750_p1 }
 0x1d8   : > { %865 = dma.done.wait (%p751_p2), %s594_s24, 128  }
 0x1d9   : > { %867 = vsyncadd (%p751_p2), %s594_s24, 4294967168  ;;  %s19_s26 = sadd.s32 1, %s890_s26   ;;  %s1096_s21 = smov %s874_s22 }
 0x1da   : > { %p16_p3 = scmp.ge.s32.totalorder %s19_s26, 4   ;;  %s1097_s22 = smov %s878_s23 }
 0x1db   : > { %s1098_s23 = smov %s986_s10  ;;  %s1099_s24 = smov %s886_s25 }
 0x1dc   : > { %s1100_s25 = smov %s1102_s29  ;;  %18 = sbr.rel (!%p16_p3) target bundleno = 4 (0x4), region = 96 }
 0x1e1   :  { %599 = vsyncpa [#allocation4], 1 }
 0x1e2   :  { %601 = vsyncpa [#allocation4 + $0x1], 1 }

</bundles_post_ra>
